<compile_context>
chip_gen: v7x
topology: tpu7x:2x2x1
jax: 0.10.0
libtpu: 0.0.40
codegen_flags: <defaults>
</compile_context>

<pallas_src>
import jax
import jax.numpy as jnp
from jax.experimental import pallas as pl
from jax.experimental.pallas import tpu as pltpu

HIDDEN_DIM = 32
INPUT_DIM = 1
OUTPUT_DIM = 1
NUM_LAYERS = 4  # unused by the forward pass (matches the PyTorch module)


# ----------------------------------------------------------------------------
# Fast path: input_dim == 1 and output_dim == 1 (the module's configuration).
# ----------------------------------------------------------------------------
def _mlp_packed_kernel(x_ref, p_ref, b2_ref, o_ref):
    """Fused fc1 + ReLU + fc2 on the (already-selected) last timestep.

    x_ref:  (B, 1)  last-timestep input, VMEM
    p_ref:  (3, H)  packed params: row 0 = w1 (1,H), row 1 = b1, row 2 = w2^T
    b2_ref: (1, 1)  fc2 bias scalar, SMEM
    o_ref:  (1, B)  lane-dense output (B on the lane axis)
    """
    x_last = x_ref[...].astype(jnp.float32)              # (B, 1)
    w1 = p_ref[pl.ds(0, 1), :]                            # (1, H)
    b1 = p_ref[pl.ds(1, 1), :]                            # (1, H)
    w2 = p_ref[pl.ds(2, 1), :]                            # (1, H)

    # fc1 (K == 1 -> VPU broadcast multiply, exact f32, no MXU) + bias + ReLU
    h = jnp.maximum(x_last * w1 + b1, 0.0)                # (B, H)

    # fc2 (N == 1 -> VPU multiply + XLU lane reduction, no MXU push/pop)
    o = jnp.sum(h * w2, axis=-1)                          # (B,)

    b2 = b2_ref[0, 0]                                     # SMEM scalar read
    o_ref[...] = (o[None, :] + b2).astype(o_ref.dtype)    # (1, B) store


def pack_params(w1, b1, w2, b2):
    """One-time (parameter-load time) packing for the D == 1, O == 1 path.

    w1: (1, H)   fc1 weight, (in, out) layout
    b1: (H,)     fc1 bias
    w2: (H, 1)   fc2 weight, (in, out) layout
    b2: (1,)     fc2 bias
    """
    H = w1.shape[1]
    packed = jnp.concatenate(
        [w1.reshape(1, H), b1.reshape(1, H), w2.T.reshape(1, H)],
        axis=0,
    ).astype(jnp.float32)                                  # (3, H)
    b2_smem = b2.reshape(1, 1).astype(jnp.float32)         # (1, 1) SMEM scalar
    return packed, b2_smem


@jax.jit
def mlp_forward(x, packed_params, b2_smem):
    """Pallas implementation of MLP.forward for input_dim=1, output_dim=1.

    hidden = fc1(x); relu = ReLU(hidden); out = fc2(relu[:, -1, :])
    """
    B, S, D = x.shape
    # Only the last timestep ever reaches fc2: slice here (inside jit) so the
    # kernel DMAs B*D elements instead of B*S*D.
    x_last = x[:, -1, :]                                   # (B, 1)

    out_lane = pl.pallas_call(
        _mlp_packed_kernel,
        out_shape=jax.ShapeDtypeStruct((1, B), x.dtype),
        in_specs=[
            pl.BlockSpec(memory_space=pltpu.MemorySpace.VMEM),   # x_last
            pl.BlockSpec(memory_space=pltpu.MemorySpace.VMEM),   # packed params
            pl.BlockSpec(memory_space=pltpu.MemorySpace.SMEM),   # b2 scalar
        ],
        out_specs=pl.BlockSpec(memory_space=pltpu.MemorySpace.VMEM),
    )(x_last, packed_params, b2_smem)

    # (1, B) -> (B, 1): metadata-only reshape under jit.
    return out_lane.reshape(B, OUTPUT_DIM)


# ----------------------------------------------------------------------------
# General fallback (D > 1 or O > 1).  Not exercised by the module's constants;
# kept so growing shapes have a correct path.  No Precision.HIGHEST here.
# ----------------------------------------------------------------------------
def _mlp_general_kernel(x_ref, w1_ref, b1_ref, w2_ref, b2_ref, o_ref):
    x_last = x_ref[...].astype(jnp.float32)                # (B, D)
    h = jnp.dot(x_last, w1_ref[...].astype(jnp.float32),
                preferred_element_type=jnp.float32)        # (B, H)
    h = jnp.maximum(h + b1_ref[...].astype(jnp.float32), 0.0)
    o = jnp.dot(h, w2_ref[...].astype(jnp.float32),
                preferred_element_type=jnp.float32)        # (B, O)
    o_ref[...] = (o + b2_ref[...].astype(jnp.float32)).astype(o_ref.dtype)


@jax.jit
def mlp_forward_general(x, w1, b1, w2, b2):
    B, S, D = x.shape
    H = w1.shape[1]
    O = w2.shape[1]
    x_last = x[:, -1, :]
    return pl.pallas_call(
        _mlp_general_kernel,
        out_shape=jax.ShapeDtypeStruct((B, O), x.dtype),
        in_specs=[pl.BlockSpec(memory_space=pltpu.MemorySpace.VMEM)] * 5,
        out_specs=pl.BlockSpec(memory_space=pltpu.MemorySpace.VMEM),
    )(x_last, w1, b1.reshape(1, H), w2, b2.reshape(1, O))


# ----------------------------------------------------------------------------
# Pure-JAX reference (matches the PyTorch module semantics).
# ----------------------------------------------------------------------------
def mlp_reference(x, w1, b1, w2, b2):
    h = jnp.einsum("bsd,dh->bsh", x, w1,
                   precision=jax.lax.Precision.HIGHEST) + b1
    h = jnp.maximum(h, 0.0)
    return jnp.dot(h[:, -1, :], w2,
                   precision=jax.lax.Precision.HIGHEST) + b2


if __name__ == "__main__":
    key = jax.random.PRNGKey(0)
    kx, k1, k2, k3, k4 = jax.random.split(key, 5)

    B, S = 2, 8  # batch=2, seq=8, input_dim=1
    x = jax.random.normal(kx, (B, S, INPUT_DIM), dtype=jnp.float32)

    # Deterministic parameter init (PyTorch Linear-style uniform bounds),
    # stored as (in, out) so the math is x @ W + b.
    bound1 = 1.0 / (INPUT_DIM ** 0.5)
    w1 = jax.random.uniform(k1, (INPUT_DIM, HIDDEN_DIM), jnp.float32, -bound1, bound1)
    b1 = jax.random.uniform(k2, (HIDDEN_DIM,), jnp.float32, -bound1, bound1)
    bound2 = 1.0 / (HIDDEN_DIM ** 0.5)
    w2 = jax.random.uniform(k3, (HIDDEN_DIM, OUTPUT_DIM), jnp.float32, -bound2, bound2)
    b2 = jax.random.uniform(k4, (OUTPUT_DIM,), jnp.float32, -bound2, bound2)

    # One-time parameter packing (parameter-load time, not per call).
    packed_params, b2_smem = pack_params(w1, b1, w2, b2)

    out = mlp_forward(x, packed_params, b2_smem)
    out = jax.block_until_ready(out)

    ref = mlp_reference(x, w1, b1, w2, b2)
    assert out.shape == (B, OUTPUT_DIM), out.shape
    assert jnp.allclose(out, ref, rtol=1e-4, atol=1e-4), (out, ref)

    print("KERNEL_OK")
</pallas_src>

<mosaic_0001>
module attributes {stable_mosaic.version = 11 : i64} {
  func.func @_mlp_packed_kernel(%arg0: memref<2x1xf32, #tpu.memory_space<vmem>>, %arg1: memref<3x32xf32, #tpu.memory_space<vmem>>, %arg2: memref<1x1xf32, #tpu.memory_space<smem>>, %arg3: memref<1x2xf32, #tpu.memory_space<vmem>>) attributes {dimension_semantics = [], scalar_prefetch = 0 : i64, scratch_operands = 0 : i64, tpu.core_type = #tpu.core_type<tc>} {
    %c0 = arith.constant 0 : index
    %c0_0 = arith.constant 0 : index
    %0 = vector.load %arg0[%c0, %c0_0] : memref<2x1xf32, #tpu.memory_space<vmem>>, vector<2x1xf32>
    %c0_1 = arith.constant 0 : index
    %c0_2 = arith.constant 0 : index
    %1 = vector.load %arg1[%c0_1, %c0_2] : memref<3x32xf32, #tpu.memory_space<vmem>>, vector<1x32xf32>
    %c1 = arith.constant 1 : index
    %c0_3 = arith.constant 0 : index
    %2 = vector.load %arg1[%c1, %c0_3] : memref<3x32xf32, #tpu.memory_space<vmem>>, vector<1x32xf32>
    %c2 = arith.constant 2 : index
    %c0_4 = arith.constant 0 : index
    %3 = vector.load %arg1[%c2, %c0_4] : memref<3x32xf32, #tpu.memory_space<vmem>>, vector<1x32xf32>
    %4 = vector.broadcast %0 : vector<2x1xf32> to vector<2x32xf32>
    %5 = vector.broadcast %1 : vector<1x32xf32> to vector<2x32xf32>
    %6 = arith.mulf %4, %5 : vector<2x32xf32>
    %7 = vector.broadcast %2 : vector<1x32xf32> to vector<2x32xf32>
    %8 = arith.addf %6, %7 : vector<2x32xf32>
    %cst = arith.constant 0.000000e+00 : f32
    %9 = vector.broadcast %cst : f32 to vector<2x32xf32>
    %10 = arith.maximumf %8, %9 : vector<2x32xf32>
    %11 = vector.broadcast %3 : vector<1x32xf32> to vector<2x32xf32>
    %12 = arith.mulf %10, %11 : vector<2x32xf32>
    %cst_5 = arith.constant dense<0.000000e+00> : vector<2xf32>
    %13 = vector.multi_reduction <add>, %12, %cst_5 [1] : vector<2x32xf32> to vector<2xf32>
    %c0_6 = arith.constant 0 : index
    %c0_7 = arith.constant 0 : index
    %14 = memref.load %arg2[%c0_6, %c0_7] : memref<1x1xf32, #tpu.memory_space<smem>>
    %15 = vector.shape_cast %13 : vector<2xf32> to vector<1x2xf32>
    %16 = vector.broadcast %14 : f32 to vector<1x2xf32>
    %17 = arith.addf %15, %16 : vector<1x2xf32>
    %c0_8 = arith.constant 0 : index
    %c0_9 = arith.constant 0 : index
    %18 = vector.load %arg3[%c0_8, %c0_9] : memref<1x2xf32, #tpu.memory_space<vmem>>, vector<1x2xf32>
    tpu.vector_store %arg3[%c0_8, %c0_9], %17 {strides = array<i32>} : memref<1x2xf32, #tpu.memory_space<vmem>>, vector<1x2xf32>,
    return
  }
}

</mosaic_0001>

<bundles_post_ra>
// kernel: mlp_forward.1
= control target key start
LH: loop header
LB: loop body
LE: loop exit
PB: predicated region body
PF: predicated region fallthrough
CT: control target
= control target key end

     0   :  { %v102_v1 = vmov 0   ;;  %s151_s0 = inlined_call_operand.vmem [shape: f32[2,1], index: 0, kind: input, shape index: {}]   ;;  %s152_s1 = inlined_call_operand.vmem [shape: f32[3,32], index: 1, kind: input, shape index: {}]   ;;  %s153_s2 = inlined_call_operand.<no memory space> [shape: f32[1,1], index: 2, kind: input, shape index: {}]   ;;  %s154_s3 = inlined_call_operand.hbm [shape: f32[1,2], index: 3, kind: output, shape index: {}]  }
   0x1   :  { %v16_v0 = vld [vmem:[%s151_s0] sm:$0x3]  ;;  %77 = vset.pattern.permute.xlu0 %v102_v1 }
   0x2   :  { %9 = vsyncpa [#allocation4], 0  ;;  %22 = vperm.xlu0 %77, %v16_v0   ;;  %v72_v2 = vld [vmem:[%s152_s1] ss:$0 sm:$0xff]  ;;  %v73_v3 = vld [vmem:[%s152_s1 + $0x1] ss:$0 sm:$0xff]  ;;  %v49_v11 = vlaneseq  ;;  %v46_v14 = vstv %s153_s2 }
   0x3   :  { %v74_v7 = vld [vmem:[%s152_s1 + $0x2] ss:$0 sm:$0xff]  ;;  %vm41_vm0 = vcmask 254976   ;;  %s103_s21 = smov [#allocation3]   ;;  %vm56_vm1 = vcmask 8192  }
   0x4   :  { %v50_v12 = vand.u32 127, %v49_v11  ;;  %v52_v13 = vshrl.u32 %v49_v11, 7  ;;  %s64_s22 = sshll.u32 %s103_s21, 4  ;;  %s65_s22 = int_to_ptr.vmem [resolvable:$true] %s64_s22 }
   0x5   :  { %s78_s1 = scalar_lea.vmem %s65_s22, 16  ;;  %s82_s23 = scalar_lea.vmem %s65_s22, 32 }
   0x6   :  { %v53_v15 = vsub.s32 %v50_v12, %v52_v13  ;;  %p79_p0 = scmp.ne.s32.totalorder %s65_s22, %s78_s1  ;;  %p83_p1 = scmp.lt.s32.totalorder %s65_s22, %s65_s22 }
   0x7   :  { %p84_p2 = scmp.lt.s32.totalorder %s82_s23, %s78_s1 }
   0x9   :  { %p85_p3 = por %p84_p2, %p83_p1 }
   0xb   :  { %p86_p4 = pnand %p85_p3, %p79_p0 }
  0x81   :  { %v23_v4 = vpop.permute.xlu0 %22 }
  0x82   :  { %v29_v5 = vmul.f32 %v72_v2, %v23_v4 }
  0x84   :  { %v34_v6 = vadd.f32 %v73_v3, %v29_v5 }
  0x86   :  { %v35_v8 = vmax.f32 %v34_v6, 0.0 }
  0x88   :  { %v40_v9 = vmul.f32 %v74_v7, %v35_v8 }
  0x8a   :  { %v42_v10 = vsel %vm41_vm0, %v40_v9, 0.0 }
  0x8b   :  { %43 = vadd.xlane.f32.xlu0 %v42_v10 }
 0x118   :  { %v44_v16 = vpop.xlane.xlu0 %43 }
 0x119   :  { %v47_v17 = vadd.f32 %v46_v14, %v44_v16 }
 0x11b   :  { %v54_v18 = vrot.slane %v47_v17, %v53_v15 }
 0x11d   :  { %57 = vst.msk [vmem:[#allocation3] sm:$0x1] %vm56_vm1, %v54_v18 }
 0x11e   :  { %89 = shalt.err (!%p86_p4)
}
 0x11f   :  { %s90_s2 = scalar_lea.hbm %s154_s3, 16 }
 0x120   :  { %p91_p5 = scmp.ne.s32.totalorder %s154_s3, %s90_s2  ;;  %p94_p6 = scmp.lt.u32.totalorder %s90_s2, %s154_s3 }
 0x122   :  { %p96_p7 = pnand %p94_p6, %p91_p5 }
 0x124   :  { %99 = shalt.err (!%p96_p7)
}
 0x125   :  { %67 = dma.vmem_to_hbm [thread:$0]  %s65_s22, 16, %s154_s3, [#allocation4]  }
 0x126   :  { %100 = dma.done.wait [#allocation4], 16  }
 0x127   :  { %101 = vsyncadd [#allocation4], 4294967280 }
 0x128   :  { %71 = vsyncpa [#allocation4], 1 }

</bundles_post_ra>
